<compile_context>
chip_gen: v7x
topology: tpu7x:2x2x1
jax: 0.10.0
libtpu: 0.0.40
codegen_flags: <defaults>
</compile_context>

<pallas_src>
import functools
import math

import jax
import jax.numpy as jnp
from jax.experimental import pallas as pl
from jax.experimental.pallas import tpu as pltpu


DEFAULT_BATCH_BLOCK = 512        # upper bound on rows per grid step
VMEM_BUDGET_BYTES = 24 * 1024 * 1024   # conservative: fits v7x scoped default


def _round_up(x, m):
    return ((x + m - 1) // m) * m


def actor_kernel(state_ref, hx_ref, w1_ref, wgru_ref, w2_ref, whead_ref, bias_ref,
                 heads_ref, hx_out_ref, *, hp, head_pad):
    Hp = hp
    f32 = jnp.float32
    bf16 = jnp.bfloat16

    # Bias slab: one bias per sublane row, each starting at lane 0 (128-aligned).
    #   row 0: b1 (Hp) | row 1: bi (3Hp) | row 2: bh (3Hp) | row 3: b2 (Hp)
    #   row 4: bhead (head_pad)
    b1 = bias_ref[0:1, 0:Hp]
    bi = bias_ref[1:2, 0:3 * Hp]
    bh = bias_ref[2:3, 0:3 * Hp]
    b2 = bias_ref[3:4, 0:Hp]
    bhead = bias_ref[4:5, 0:head_pad]

    state = state_ref[...]                 # bf16 (cast at the HBM boundary)
    h = hx_ref[...]                        # f32 recurrent carry (lane-padded)

    # fc1 + ReLU
    x = jnp.dot(state, w1_ref[...], preferred_element_type=f32) + b1
    x = jnp.maximum(x, 0.0)

    # GRUCell (PyTorch semantics), fused gates (r|z|n), each gate Hp lanes wide:
    #   r = sigmoid(gi_r + gh_r);  z = sigmoid(gi_z + gh_z)
    #   n = tanh(gi_n + r * gh_n); h' = (1 - z) * n + z * h
    gi = jnp.dot(x.astype(bf16), wgru_ref[0], preferred_element_type=f32) + bi
    gh = jnp.dot(h.astype(bf16), wgru_ref[1], preferred_element_type=f32) + bh

    r = jax.nn.sigmoid(gi[:, 0:Hp] + gh[:, 0:Hp])
    z = jax.nn.sigmoid(gi[:, Hp:2 * Hp] + gh[:, Hp:2 * Hp])
    n = jnp.tanh(gi[:, 2 * Hp:3 * Hp] + r * gh[:, 2 * Hp:3 * Hp])
    h_new = (1.0 - z) * n + z * h

    # fc2 + ReLU
    y = jnp.dot(h_new.astype(bf16), w2_ref[...], preferred_element_type=f32) + b2
    y = jnp.maximum(y, 0.0)

    # Fused heads: [ mu | log_std | zero-pad ]  (clamp on the sliced half in the
    # wrapper so this store stays one full-width, lane-dense vst).
    heads = jnp.dot(y.astype(bf16), whead_ref[...], preferred_element_type=f32) + bhead

    heads_ref[...] = heads
    hx_out_ref[...] = h_new                # lane-dense (Hp multiple of 128)


def init_actor_params(key, state_dim, action_dim, hidden_dim):
    """PyTorch-default-style init (U(-1/sqrt(fan_in), 1/sqrt(fan_in))), packed
    into the fused, 128-lane-padded layout consumed by the kernel."""
    H, A = hidden_dim, action_dim
    Hp = _round_up(H, 128)                 # padded hidden width
    HPh = _round_up(2 * A, 128)            # fused head width
    bias_w = max(3 * Hp, HPh)

    def uniform(k, shape, fan_in):
        bound = 1.0 / math.sqrt(fan_in)
        return jax.random.uniform(k, shape, jnp.float32, -bound, bound)

    ks = jax.random.split(key, 12)
    w1 = uniform(ks[0], (state_dim, H), state_dim)
    b1 = uniform(ks[1], (H,), state_dim)
    wi = uniform(ks[2], (H, 3 * H), H)     # GRU input->hidden, gates r|z|n
    bi = uniform(ks[3], (3 * H,), H)
    wh = uniform(ks[4], (H, 3 * H), H)     # GRU hidden->hidden, gates r|z|n
    bh = uniform(ks[5], (3 * H,), H)
    w2 = uniform(ks[6], (H, H), H)
    b2 = uniform(ks[7], (H,), H)
    wmu = uniform(ks[8], (H, A), H)
    bmu = uniform(ks[9], (A,), H)
    wls = uniform(ks[10], (H, A), H)
    bls = uniform(ks[11], (A,), H)

    # --- pad into 128-lane-aligned slabs -----------------------------------
    w1_p = jnp.zeros((state_dim, Hp), jnp.float32).at[:, :H].set(w1)
    w2_p = jnp.zeros((Hp, Hp), jnp.float32).at[:H, :H].set(w2)
    whead = (jnp.zeros((Hp, HPh), jnp.float32)
             .at[:H, :A].set(wmu).at[:H, A:2 * A].set(wls))

    def pad_gru_w(w):
        out = jnp.zeros((Hp, 3 * Hp), jnp.float32)
        for g in range(3):                 # each gate block padded to Hp lanes
            out = out.at[:H, g * Hp:g * Hp + H].set(w[:, g * H:(g + 1) * H])
        return out

    def pad_gru_b(b):
        out = jnp.zeros((3 * Hp,), jnp.float32)
        for g in range(3):
            out = out.at[g * Hp:g * Hp + H].set(b[g * H:(g + 1) * H])
        return out

    bias = jnp.zeros((5, bias_w), jnp.float32)
    bias = bias.at[0, :H].set(b1)
    bias = bias.at[1, :3 * Hp].set(pad_gru_b(bi))
    bias = bias.at[2, :3 * Hp].set(pad_gru_b(bh))
    bias = bias.at[3, :H].set(b2)
    bias = bias.at[4, :A].set(bmu).at[4, A:2 * A].set(bls)

    return {
        "w1": w1_p.astype(jnp.bfloat16),
        "wgru": jnp.stack([pad_gru_w(wi), pad_gru_w(wh)]).astype(jnp.bfloat16),
        "w2": w2_p.astype(jnp.bfloat16),
        "whead": whead.astype(jnp.bfloat16),
        "bias": bias,                      # biases stay f32
    }


@functools.partial(jax.jit, static_argnames=("action_dim", "hidden_dim"))
def actor_forward(state, hx, params, *, action_dim, hidden_dim):
    # Glue: PyTorch forward flattens a 3D state to 2D.
    if state.ndim == 3:
        state = state.reshape(-1, state.shape[-1])
    B, S = state.shape
    H, A = hidden_dim, action_dim
    Hp = params["w2"].shape[0]
    HPh = params["whead"].shape[1]
    n_bias, bias_w = params["bias"].shape

    flat_params = [params["w1"], params["wgru"], params["w2"],
                   params["whead"], params["bias"]]
    weight_bytes = sum(int(p.size) * p.dtype.itemsize for p in flat_params)

    # Batch tiling: >=2 "parallel" grid steps when B > 8 (dual TC on v7x), with
    # a VMEM-aware cap so large hidden_dim configs don't overshoot v7x VMEM.
    if B <= 8:
        bb = B
    else:
        half = (B + 1) // 2
        bb = min(DEFAULT_BATCH_BLOCK, _round_up(half, 16))
        act_bytes_per_row = (14 * Hp + 2 * HPh) * 4 + 4 * S
        cap = (VMEM_BUDGET_BYTES - 2 * weight_bytes) // max(act_bytes_per_row, 1)
        if cap >= 16:
            bb = min(bb, max(16, (cap // 16) * 16))
    Bp = pl.cdiv(B, bb) * bb
    grid = (Bp // bb,)

    # Cast the streamed input to bf16 at the HBM boundary; keep the carry f32.
    state = state.astype(jnp.bfloat16)
    if Bp != B:
        state = jnp.pad(state, ((0, Bp - B), (0, 0)))
    if Bp != B or Hp != H:
        hx_p = jnp.pad(hx.astype(jnp.float32), ((0, Bp - B), (0, Hp - H)))
    else:
        hx_p = hx.astype(jnp.float32)

    in_specs = [
        pl.BlockSpec((bb, S), lambda i: (i, 0)),             # state (batch-tiled, bf16)
        pl.BlockSpec((bb, Hp), lambda i: (i, 0)),            # hx    (batch-tiled, f32)
        pl.BlockSpec((S, Hp), lambda i: (0, 0)),             # w1    (VMEM-resident)
        pl.BlockSpec((2, Hp, 3 * Hp), lambda i: (0, 0, 0)),  # wgru  (VMEM-resident)
        pl.BlockSpec((Hp, Hp), lambda i: (0, 0)),            # w2    (VMEM-resident)
        pl.BlockSpec((Hp, HPh), lambda i: (0, 0)),           # whead (VMEM-resident)
        pl.BlockSpec((n_bias, bias_w), lambda i: (0, 0)),    # bias  (VMEM-resident)
    ]
    out_specs = (
        pl.BlockSpec((bb, HPh), lambda i: (i, 0)),           # fused heads (lane-dense)
        pl.BlockSpec((bb, Hp), lambda i: (i, 0)),            # hx_new      (lane-dense)
    )

    io_bytes = 2 * Bp * S + 4 * Bp * Hp * 2 + 4 * Bp * HPh
    cost = pl.CostEstimate(
        flops=2 * Bp * (S * Hp + 2 * Hp * 3 * Hp + Hp * Hp + Hp * HPh),
        transcendentals=3 * Bp * Hp,
        bytes_accessed=weight_bytes + io_bytes,
    )

    heads, hx_new = pl.pallas_call(
        functools.partial(actor_kernel, hp=Hp, head_pad=HPh),
        out_shape=(
            jax.ShapeDtypeStruct((Bp, HPh), jnp.float32),
            jax.ShapeDtypeStruct((Bp, Hp), jnp.float32),
        ),
        grid_spec=pltpu.PrefetchScalarGridSpec(
            num_scalar_prefetch=0,
            grid=grid,
            in_specs=in_specs,
            out_specs=out_specs,
        ),
        compiler_params=pltpu.CompilerParams(
            dimension_semantics=("parallel",),
            vmem_limit_bytes=64 * 1024 * 1024,
        ),
        cost_estimate=cost,
        input_output_aliases={1: 1},       # hx -> hx_new (recurrent carry writeback)
    )(state, hx_p, *flat_params)

    mu = heads[:B, :A]
    log_std = jnp.clip(heads[:B, A:2 * A], -20.0, 2.0)
    return mu, log_std, hx_new[:B, :H]


def actor_forward_ref(state, hx, params, *, action_dim, hidden_dim):
    """Pure-JAX reference (same fused/padded bf16-weight layout) for checks."""
    H, A = hidden_dim, action_dim
    Hp = params["w2"].shape[0]
    HPh = params["whead"].shape[1]
    bf16, f32 = jnp.bfloat16, jnp.float32
    if state.ndim == 3:
        state = state.reshape(-1, state.shape[-1])

    bias = params["bias"]
    b1, bi = bias[0, :Hp], bias[1, :3 * Hp]
    bh, b2 = bias[2, :3 * Hp], bias[3, :Hp]
    bhead = bias[4, :HPh]
    wi, wh = params["wgru"][0], params["wgru"][1]
    h = jnp.pad(hx.astype(f32), ((0, 0), (0, Hp - H)))

    def mm(a, w):
        return jnp.dot(a.astype(bf16), w, preferred_element_type=f32)

    x = jax.nn.relu(mm(state, params["w1"]) + b1)
    gi = mm(x, wi) + bi
    gh = mm(h, wh) + bh
    r = jax.nn.sigmoid(gi[:, 0:Hp] + gh[:, 0:Hp])
    z = jax.nn.sigmoid(gi[:, Hp:2 * Hp] + gh[:, Hp:2 * Hp])
    n = jnp.tanh(gi[:, 2 * Hp:3 * Hp] + r * gh[:, 2 * Hp:3 * Hp])
    h_new = (1.0 - z) * n + z * h
    y = jax.nn.relu(mm(h_new, params["w2"]) + b2)
    heads = mm(y, params["whead"]) + bhead
    mu = heads[:, :A]
    log_std = jnp.clip(heads[:, A:2 * A], -20.0, 2.0)
    return mu, log_std, h_new[:, :H]


if __name__ == "__main__":
    batch = 2
    state_dim = 8
    action_dim = 4
    hidden_dim = 32

    key = jax.random.PRNGKey(0)
    k_params, k_state, k_hx = jax.random.split(key, 3)

    params = init_actor_params(k_params, state_dim, action_dim, hidden_dim)
    state = jax.random.normal(k_state, (batch, state_dim), jnp.float32)
    hx = jax.random.normal(k_hx, (batch, hidden_dim), jnp.float32)

    mu, log_std, hx_new = actor_forward(
        state, hx, params, action_dim=action_dim, hidden_dim=hidden_dim
    )
    jax.block_until_ready((mu, log_std, hx_new))

    mu_r, log_std_r, hx_r = actor_forward_ref(
        state, hx, params, action_dim=action_dim, hidden_dim=hidden_dim
    )

    assert mu.shape == (batch, action_dim)
    assert log_std.shape == (batch, action_dim)
    assert hx_new.shape == (batch, hidden_dim)
    assert jnp.allclose(mu, mu_r, atol=1e-3, rtol=1e-3), "mu mismatch"
    assert jnp.allclose(log_std, log_std_r, atol=1e-3, rtol=1e-3), "log_std mismatch"
    assert jnp.allclose(hx_new, hx_r, atol=1e-3, rtol=1e-3), "hx mismatch"

    print("KERNEL_OK")
</pallas_src>

<mosaic_0001>
module attributes {stable_mosaic.version = 11 : i64} {
  func.func @actor_kernel(%arg0: i32, %arg1: memref<2x8xbf16, #tpu.memory_space<vmem>>, %arg2: memref<2x128xf32, #tpu.memory_space<vmem>>, %arg3: memref<8x128xbf16, #tpu.memory_space<vmem>>, %arg4: memref<2x128x384xbf16, #tpu.memory_space<vmem>>, %arg5: memref<128x128xbf16, #tpu.memory_space<vmem>>, %arg6: memref<128x128xbf16, #tpu.memory_space<vmem>>, %arg7: memref<5x384xf32, #tpu.memory_space<vmem>>, %arg8: memref<2x128xf32, #tpu.memory_space<vmem>>, %arg9: memref<2x128xf32, #tpu.memory_space<vmem>>) attributes {dimension_semantics = [#tpu.dimension_semantics<parallel>], iteration_bounds = array<i64: 1>, scalar_prefetch = 0 : i64, scratch_operands = 0 : i64, tpu.core_type = #tpu.core_type<tc>, window_params = [{transform_indices = @transform_0, window_bounds = array<i64: 2, 8>}, {transform_indices = @transform_1, window_bounds = array<i64: 2, 128>}, {pipeline_mode = #tpu.pipeline_mode<synchronous>, transform_indices = @transform_2, window_bounds = array<i64: 8, 128>}, {pipeline_mode = #tpu.pipeline_mode<synchronous>, transform_indices = @transform_3, window_bounds = array<i64: 2, 128, 384>}, {pipeline_mode = #tpu.pipeline_mode<synchronous>, transform_indices = @transform_4, window_bounds = array<i64: 128, 128>}, {pipeline_mode = #tpu.pipeline_mode<synchronous>, transform_indices = @transform_5, window_bounds = array<i64: 128, 128>}, {pipeline_mode = #tpu.pipeline_mode<synchronous>, transform_indices = @transform_6, window_bounds = array<i64: 5, 384>}, {transform_indices = @transform_7, window_bounds = array<i64: 2, 128>}, {transform_indices = @transform_8, window_bounds = array<i64: 2, 128>}]} {
    %c0 = arith.constant 0 : index
    %c0_0 = arith.constant 0 : index
    %0 = vector.load %arg7[%c0, %c0_0] : memref<5x384xf32, #tpu.memory_space<vmem>>, vector<1x128xf32>
    %c1 = arith.constant 1 : index
    %c0_1 = arith.constant 0 : index
    %1 = vector.load %arg7[%c1, %c0_1] : memref<5x384xf32, #tpu.memory_space<vmem>>, vector<1x384xf32>
    %c2 = arith.constant 2 : index
    %c0_2 = arith.constant 0 : index
    %2 = vector.load %arg7[%c2, %c0_2] : memref<5x384xf32, #tpu.memory_space<vmem>>, vector<1x384xf32>
    %c3 = arith.constant 3 : index
    %c0_3 = arith.constant 0 : index
    %3 = vector.load %arg7[%c3, %c0_3] : memref<5x384xf32, #tpu.memory_space<vmem>>, vector<1x128xf32>
    %c4 = arith.constant 4 : index
    %c0_4 = arith.constant 0 : index
    %4 = vector.load %arg7[%c4, %c0_4] : memref<5x384xf32, #tpu.memory_space<vmem>>, vector<1x128xf32>
    %c0_5 = arith.constant 0 : index
    %c0_6 = arith.constant 0 : index
    %5 = vector.load %arg1[%c0_5, %c0_6] : memref<2x8xbf16, #tpu.memory_space<vmem>>, vector<2x8xbf16>
    %c0_7 = arith.constant 0 : index
    %c0_8 = arith.constant 0 : index
    %6 = vector.load %arg2[%c0_7, %c0_8] : memref<2x128xf32, #tpu.memory_space<vmem>>, vector<2x128xf32>
    %c0_9 = arith.constant 0 : index
    %c0_10 = arith.constant 0 : index
    %7 = vector.load %arg3[%c0_9, %c0_10] : memref<8x128xbf16, #tpu.memory_space<vmem>>, vector<8x128xbf16>
    %cst = arith.constant dense<0.000000e+00> : vector<2x128xf32>
    %8 = tpu.matmul %5, %7, %cst {dimension_numbers = #tpu.dot_dimension_numbers<[1], [0], [0], [1], [0, 0, 1, 1], [], []>} : vector<2x8xbf16>, vector<8x128xbf16>, vector<2x128xf32> -> vector<2x128xf32>
    %9 = vector.broadcast %0 : vector<1x128xf32> to vector<2x128xf32>
    %10 = arith.addf %8, %9 : vector<2x128xf32>
    %cst_11 = arith.constant 0.000000e+00 : f32
    %11 = vector.broadcast %cst_11 : f32 to vector<2x128xf32>
    %12 = arith.maximumf %10, %11 : vector<2x128xf32>
    %13 = arith.truncf %12 : vector<2x128xf32> to vector<2x128xbf16>
    %c0_12 = arith.constant 0 : index
    %c0_13 = arith.constant 0 : index
    %c0_14 = arith.constant 0 : index
    %14 = vector.load %arg4[%c0_12, %c0_13, %c0_14] : memref<2x128x384xbf16, #tpu.memory_space<vmem>>, vector<1x128x384xbf16>
    %15 = vector.shape_cast %14 : vector<1x128x384xbf16> to vector<128x384xbf16>
    %cst_15 = arith.constant dense<0.000000e+00> : vector<2x384xf32>
    %16 = tpu.matmul %13, %15, %cst_15 {dimension_numbers = #tpu.dot_dimension_numbers<[1], [0], [0], [1], [0, 0, 1, 1], [], []>} : vector<2x128xbf16>, vector<128x384xbf16>, vector<2x384xf32> -> vector<2x384xf32>
    %17 = vector.broadcast %1 : vector<1x384xf32> to vector<2x384xf32>
    %18 = arith.addf %16, %17 : vector<2x384xf32>
    %19 = arith.truncf %6 : vector<2x128xf32> to vector<2x128xbf16>
    %c1_16 = arith.constant 1 : index
    %c0_17 = arith.constant 0 : index
    %c0_18 = arith.constant 0 : index
    %20 = vector.load %arg4[%c1_16, %c0_17, %c0_18] : memref<2x128x384xbf16, #tpu.memory_space<vmem>>, vector<1x128x384xbf16>
    %21 = vector.shape_cast %20 : vector<1x128x384xbf16> to vector<128x384xbf16>
    %cst_19 = arith.constant dense<0.000000e+00> : vector<2x384xf32>
    %22 = tpu.matmul %19, %21, %cst_19 {dimension_numbers = #tpu.dot_dimension_numbers<[1], [0], [0], [1], [0, 0, 1, 1], [], []>} : vector<2x128xbf16>, vector<128x384xbf16>, vector<2x384xf32> -> vector<2x384xf32>
    %23 = vector.broadcast %2 : vector<1x384xf32> to vector<2x384xf32>
    %24 = arith.addf %22, %23 : vector<2x384xf32>
    %25 = vector.extract_strided_slice %18 {offsets = [0, 0], sizes = [2, 128], strides = [1, 1]} : vector<2x384xf32> to vector<2x128xf32>
    %26 = vector.extract_strided_slice %24 {offsets = [0, 0], sizes = [2, 128], strides = [1, 1]} : vector<2x384xf32> to vector<2x128xf32>
    %27 = arith.addf %25, %26 : vector<2x128xf32>
    %28 = arith.negf %27 : vector<2x128xf32>
    %29 = math.exp %28 : vector<2x128xf32>
    %cst_20 = arith.constant 1.000000e+00 : f32
    %30 = vector.broadcast %cst_20 : f32 to vector<2x128xf32>
    %31 = arith.addf %30, %29 : vector<2x128xf32>
    %32 = arith.divf %30, %31 : vector<2x128xf32>
    %33 = vector.extract_strided_slice %18 {offsets = [0, 128], sizes = [2, 128], strides = [1, 1]} : vector<2x384xf32> to vector<2x128xf32>
    %34 = vector.extract_strided_slice %24 {offsets = [0, 128], sizes = [2, 128], strides = [1, 1]} : vector<2x384xf32> to vector<2x128xf32>
    %35 = arith.addf %33, %34 : vector<2x128xf32>
    %36 = arith.negf %35 : vector<2x128xf32>
    %37 = math.exp %36 : vector<2x128xf32>
    %cst_21 = arith.constant 1.000000e+00 : f32
    %38 = vector.broadcast %cst_21 : f32 to vector<2x128xf32>
    %39 = arith.addf %38, %37 : vector<2x128xf32>
    %40 = arith.divf %38, %39 : vector<2x128xf32>
    %41 = vector.extract_strided_slice %18 {offsets = [0, 256], sizes = [2, 128], strides = [1, 1]} : vector<2x384xf32> to vector<2x128xf32>
    %42 = vector.extract_strided_slice %24 {offsets = [0, 256], sizes = [2, 128], strides = [1, 1]} : vector<2x384xf32> to vector<2x128xf32>
    %43 = arith.mulf %32, %42 : vector<2x128xf32>
    %44 = arith.addf %41, %43 : vector<2x128xf32>
    %45 = math.tanh %44 : vector<2x128xf32>
    %cst_22 = arith.constant 1.000000e+00 : f32
    %46 = vector.broadcast %cst_22 : f32 to vector<2x128xf32>
    %47 = arith.subf %46, %40 : vector<2x128xf32>
    %48 = arith.mulf %47, %45 : vector<2x128xf32>
    %49 = arith.mulf %40, %6 : vector<2x128xf32>
    %50 = arith.addf %48, %49 : vector<2x128xf32>
    %51 = arith.truncf %50 : vector<2x128xf32> to vector<2x128xbf16>
    %c0_23 = arith.constant 0 : index
    %c0_24 = arith.constant 0 : index
    %52 = vector.load %arg5[%c0_23, %c0_24] : memref<128x128xbf16, #tpu.memory_space<vmem>>, vector<128x128xbf16>
    %cst_25 = arith.constant dense<0.000000e+00> : vector<2x128xf32>
    %53 = tpu.matmul %51, %52, %cst_25 {dimension_numbers = #tpu.dot_dimension_numbers<[1], [0], [0], [1], [0, 0, 1, 1], [], []>} : vector<2x128xbf16>, vector<128x128xbf16>, vector<2x128xf32> -> vector<2x128xf32>
    %54 = vector.broadcast %3 : vector<1x128xf32> to vector<2x128xf32>
    %55 = arith.addf %53, %54 : vector<2x128xf32>
    %cst_26 = arith.constant 0.000000e+00 : f32
    %56 = vector.broadcast %cst_26 : f32 to vector<2x128xf32>
    %57 = arith.maximumf %55, %56 : vector<2x128xf32>
    %58 = arith.truncf %57 : vector<2x128xf32> to vector<2x128xbf16>
    %c0_27 = arith.constant 0 : index
    %c0_28 = arith.constant 0 : index
    %59 = vector.load %arg6[%c0_27, %c0_28] : memref<128x128xbf16, #tpu.memory_space<vmem>>, vector<128x128xbf16>
    %cst_29 = arith.constant dense<0.000000e+00> : vector<2x128xf32>
    %60 = tpu.matmul %58, %59, %cst_29 {dimension_numbers = #tpu.dot_dimension_numbers<[1], [0], [0], [1], [0, 0, 1, 1], [], []>} : vector<2x128xbf16>, vector<128x128xbf16>, vector<2x128xf32> -> vector<2x128xf32>
    %61 = vector.broadcast %4 : vector<1x128xf32> to vector<2x128xf32>
    %62 = arith.addf %60, %61 : vector<2x128xf32>
    %c0_30 = arith.constant 0 : index
    %c0_31 = arith.constant 0 : index
    %63 = vector.load %arg8[%c0_30, %c0_31] : memref<2x128xf32, #tpu.memory_space<vmem>>, vector<2x128xf32>
    tpu.vector_store %arg8[%c0_30, %c0_31], %62 {strides = array<i32>} : memref<2x128xf32, #tpu.memory_space<vmem>>, vector<2x128xf32>,
    %c0_32 = arith.constant 0 : index
    %c0_33 = arith.constant 0 : index
    %64 = vector.load %arg9[%c0_32, %c0_33] : memref<2x128xf32, #tpu.memory_space<vmem>>, vector<2x128xf32>
    tpu.vector_store %arg9[%c0_32, %c0_33], %50 {strides = array<i32>} : memref<2x128xf32, #tpu.memory_space<vmem>>, vector<2x128xf32>,
    return
  }
  func.func @transform_0(%arg0: i32) -> (i32, i32) {
    %c0_i32 = arith.constant 0 : i32
    %c0_i32_0 = arith.constant 0 : i32
    return %arg0, %c0_i32 : i32, i32
  }
  func.func @transform_1(%arg0: i32) -> (i32, i32) {
    %c0_i32 = arith.constant 0 : i32
    %c0_i32_0 = arith.constant 0 : i32
    return %arg0, %c0_i32 : i32, i32
  }
  func.func @transform_2(%arg0: i32) -> (i32, i32) {
    %c0_i32 = arith.constant 0 : i32
    %c0_i32_0 = arith.constant 0 : i32
    %c0_i32_1 = arith.constant 0 : i32
    return %c0_i32, %c0_i32_0 : i32, i32
  }
  func.func @transform_3(%arg0: i32) -> (i32, i32, i32) {
    %c0_i32 = arith.constant 0 : i32
    %c0_i32_0 = arith.constant 0 : i32
    %c0_i32_1 = arith.constant 0 : i32
    %c0_i32_2 = arith.constant 0 : i32
    return %c0_i32, %c0_i32_0, %c0_i32_1 : i32, i32, i32
  }
  func.func @transform_4(%arg0: i32) -> (i32, i32) {
    %c0_i32 = arith.constant 0 : i32
    %c0_i32_0 = arith.constant 0 : i32
    %c0_i32_1 = arith.constant 0 : i32
    return %c0_i32, %c0_i32_0 : i32, i32
  }
  func.func @transform_5(%arg0: i32) -> (i32, i32) {
    %c0_i32 = arith.constant 0 : i32
    %c0_i32_0 = arith.constant 0 : i32
    %c0_i32_1 = arith.constant 0 : i32
    return %c0_i32, %c0_i32_0 : i32, i32
  }
  func.func @transform_6(%arg0: i32) -> (i32, i32) {
    %c0_i32 = arith.constant 0 : i32
    %c0_i32_0 = arith.constant 0 : i32
    %c0_i32_1 = arith.constant 0 : i32
    return %c0_i32, %c0_i32_0 : i32, i32
  }
  func.func @transform_7(%arg0: i32) -> (i32, i32) {
    %c0_i32 = arith.constant 0 : i32
    %c0_i32_0 = arith.constant 0 : i32
    return %arg0, %c0_i32 : i32, i32
  }
  func.func @transform_8(%arg0: i32) -> (i32, i32) {
    %c0_i32 = arith.constant 0 : i32
    %c0_i32_0 = arith.constant 0 : i32
    return %arg0, %c0_i32 : i32, i32
  }
}

</mosaic_0001>

<bundles_post_ra>
// kernel: actor_forward.1
= control target key start
LH: loop header
LB: loop body
LE: loop exit
PB: predicated region body
PF: predicated region fallthrough
CT: control target
= control target key end

     0   :  { %14 = vsyncpa [#allocation3], 0  ;;  %s1720_s0 = inlined_call_operand.hbm [shape: bf16[2,8], index: 0, kind: input, shape index: {}]   ;;  %s1721_s1 = inlined_call_operand.hbm [shape: f32[2,128], index: 1, kind: input, shape index: {}, may-alias: {1,8}]   ;;  %s1722_s2 = inlined_call_operand.hbm [shape: bf16[8,128], index: 2, kind: input, shape index: {}]   ;;  %s1723_s3 = inlined_call_operand.hbm [shape: bf16[2,128,384], index: 3, kind: input, shape index: {}]   ;;  %s1724_s4 = inlined_call_operand.hbm [shape: bf16[128,128], index: 4, kind: input, shape index: {}]   ;;  %s1725_s5 = inlined_call_operand.hbm [shape: bf16[128,128], index: 5, kind: input, shape index: {}]   ;;  %s1726_s6 = inlined_call_operand.hbm [shape: f32[5,384], index: 6, kind: input, shape index: {}]   ;;  %s1727_s7 = inlined_call_operand.hbm [shape: f32[2,128], index: 7, kind: output, shape index: {0}]   ;;  %s1728_s8 = inlined_call_operand.hbm [shape: f32[2,128], index: 8, kind: output, shape index: {1}, may-alias: {1,8}]  }
   0x1   :  { %15 = vsyncpa [#allocation6], 0 }
   0x2   :  { %16 = vsyncpa [#allocation9], 0 }
   0x3   :  { %17 = vsyncpa [#allocation12], 0 }
   0x4   :  { %18 = vsyncpa [#allocation4], 0 }
   0x5   :  { %19 = vsyncpa [#allocation16], 0  ;;  %s1475_s27 = smov [#allocation5]   ;;  %s1476_s29 = smov [#allocation8]  }
   0x6   :  { %s36_s28 = sshll.u32 %s1475_s27, 4  ;;  %s55_s30 = sshll.u32 %s1476_s29, 4  ;;  %s37_s28 = int_to_ptr.vmem [resolvable:$true] %s36_s28  ;;  %s1536_s30 = int_to_ptr.vmem [resolvable:$true] %s55_s30 }
   0x7   :  { %s1265_s11 = scalar_lea.hbm %s1721_s1, 32 }
   0x8   :  { %p1266_p0 = scmp.ne.s32.totalorder %s1721_s1, %s1265_s11  ;;  %p1269_p1 = scmp.lt.u32.totalorder %s1265_s11, %s1721_s1 }
   0xa   :  { %p1271_p2 = pnand %p1269_p1, %p1266_p0 }
   0xc   :  { %1274 = shalt.err (!%p1271_p2)
}
   0xd   :  { %s1275_s16 = scalar_lea.vmem %s37_s28, 32  ;;  %p1280_p4 = scmp.lt.s32.totalorder %s37_s28, %s37_s28 }
   0xe   :  { %p1276_p3 = scmp.ne.s32.totalorder %s37_s28, %s1275_s16  ;;  %p1281_p5 = scmp.lt.s32.totalorder %s1275_s16, %s1275_s16 }
  0x10   :  { %p1282_p6 = por %p1281_p5, %p1280_p4 }
  0x12   :  { %p1283_p7 = pnand %p1282_p6, %p1276_p3 }
  0x14   :  { %1286 = shalt.err (!%p1283_p7)
}
  0x15   :  { %39 = dma.hbm_to_vmem [thread:$0]  %s1721_s1, 32, %s37_s28, [#allocation6]  }
  0x16   :  { %s1287_s21 = scalar_lea.hbm %s1723_s3, 6144 }
  0x17   :  { %p1288_p8 = scmp.ne.s32.totalorder %s1723_s3, %s1287_s21  ;;  %p1291_p9 = scmp.lt.u32.totalorder %s1287_s21, %s1723_s3 }
  0x19   :  { %p1293_p10 = pnand %p1291_p9, %p1288_p8 }
  0x1b   :  { %1296 = shalt.err (!%p1293_p10)
}
  0x1c   :  { %s1297_s26 = scalar_lea.vmem %s1536_s30, 6144  ;;  %p1302_p12 = scmp.lt.s32.totalorder %s1536_s30, %s1536_s30 }
  0x1d   :  { %p1298_p11 = scmp.ne.s32.totalorder %s1536_s30, %s1297_s26  ;;  %p1303_p13 = scmp.lt.s32.totalorder %s1297_s26, %s1297_s26 }
  0x1f   :  { %p1304_p0 = por %p1303_p13, %p1302_p12 }
  0x21   :  { %p1305_p1 = pnand %p1304_p0, %p1298_p11 }
  0x23   :  { %1308 = shalt.err (!%p1305_p1)
}
  0x24   :  { %s1477_s1 = smov 192   ;;  %s1478_s27 = smov 12  }
  0x25   :  { %61 = dma.hbm_to_vmem [thread:$0]  %s1723_s3, 6144, %s1536_s30, [#allocation9], %s1477_s1, %s1477_s1, %s1478_s27  }
  0x26   :  { %s1479_s9 = smov [#allocation11]   ;;  %s1480_s11 = smov [#allocation2]  }
  0x27   :  { %s79_s10 = sshll.u32 %s1479_s9, 4  ;;  %s26_s12 = sshll.u32 %s1480_s11, 4  ;;  %s80_s10 = int_to_ptr.vmem [resolvable:$true] %s79_s10  ;;  %s1567_s12 = int_to_ptr.vmem [resolvable:$true] %s26_s12 }
  0x28   :  { %s1309_s15 = scalar_lea.hbm %s1725_s5, 1024 }
  0x29   :  { %p1310_p2 = scmp.ne.s32.totalorder %s1725_s5, %s1309_s15  ;;  %p1313_p3 = scmp.lt.u32.totalorder %s1309_s15, %s1725_s5 }
  0x2b   :  { %p1315_p4 = pnand %p1313_p3, %p1310_p2 }
  0x2d   :  { %1318 = shalt.err (!%p1315_p4)
}
  0x2e   :  { %s1319_s3 = scalar_lea.vmem %s80_s10, 1024  ;;  %p1324_p6 = scmp.lt.s32.totalorder %s80_s10, %s80_s10 }
  0x2f   :  { %p1320_p5 = scmp.ne.s32.totalorder %s80_s10, %s1319_s3  ;;  %p1325_p7 = scmp.lt.s32.totalorder %s1319_s3, %s1319_s3 }
  0x31   :  { %p1326_p8 = por %p1325_p7, %p1324_p6 }
  0x33   :  { %p1327_p9 = pnand %p1326_p8, %p1320_p5 }
  0x35   :  { %1330 = shalt.err (!%p1327_p9)
}
  0x36   :  { %s1481_s30 = smov 64   ;;  %s1482_s20 = smov 4  }
  0x37   :  { %85 = dma.hbm_to_vmem [thread:$0]  %s1725_s5, 1024, %s80_s10, [#allocation12], %s1481_s30, %s1481_s30, %s1482_s20  }
  0x38   :  { %s1331_s25 = scalar_lea.hbm %s1720_s0, 16 }
  0x39   :  { %p1332_p10 = scmp.ne.s32.totalorder %s1720_s0, %s1331_s25  ;;  %p1335_p11 = scmp.lt.u32.totalorder %s1331_s25, %s1720_s0 }
  0x3b   :  { %p1337_p12 = pnand %p1335_p11, %p1332_p10 }
  0x3d   :  { %1340 = shalt.err (!%p1337_p12)
}
  0x3e   :  { %s1341_s29 = scalar_lea.vmem %s1567_s12, 16  ;;  %s1345_s5 = scalar_lea.vmem %s1567_s12, 32 }
  0x3f   :  { %p1342_p13 = scmp.ne.s32.totalorder %s1567_s12, %s1341_s29  ;;  %p1346_p0 = scmp.lt.s32.totalorder %s1567_s12, %s1567_s12 }
  0x40   :  { %p1347_p1 = scmp.lt.s32.totalorder %s1345_s5, %s1341_s29 }
  0x42   :  { %p1348_p2 = por %p1347_p1, %p1346_p0 }
  0x44   :  { %p1349_p3 = pnand %p1348_p2, %p1342_p13 }
  0x46   :  { %1352 = shalt.err (!%p1349_p3)
}
  0x47   :  { %29 = dma.hbm_to_vmem [thread:$0]  %s1720_s0, 16, %s1567_s12, [#allocation3]  }
  0x48   :  { %s1483_s11 = smov [#allocation7]   ;;  %s1484_s14 = smov [#allocation10]  }
  0x49   :  { %s46_s13 = sshll.u32 %s1483_s11, 4  ;;  %s67_s15 = sshll.u32 %s1484_s14, 4  ;;  %s47_s13 = int_to_ptr.vmem [resolvable:$true] %s46_s13  ;;  %s1602_s15 = int_to_ptr.vmem [resolvable:$true] %s67_s15 }
  0x4a   :  { %s1353_s18 = scalar_lea.hbm %s1722_s2, 64 }
  0x4b   :  { %p1354_p4 = scmp.ne.s32.totalorder %s1722_s2, %s1353_s18  ;;  %p1357_p5 = scmp.lt.u32.totalorder %s1353_s18, %s1722_s2 }
  0x4d   :  { %p1359_p6 = pnand %p1357_p5, %p1354_p4 }
  0x4f   :  { %1362 = shalt.err (!%p1359_p6)
}
  0x50   :  { %s1363_s0 = scalar_lea.vmem %s47_s13, 64  ;;  %p1368_p8 = scmp.lt.s32.totalorder %s47_s13, %s47_s13 }
  0x51   :  { %p1364_p7 = scmp.ne.s32.totalorder %s47_s13, %s1363_s0  ;;  %p1369_p9 = scmp.lt.s32.totalorder %s1363_s0, %s1363_s0 }
  0x53   :  { %p1370_p10 = por %p1369_p9, %p1368_p8 }
  0x55   :  { %p1371_p11 = pnand %p1370_p10, %p1364_p7 }
  0x57   :  { %1374 = shalt.err (!%p1371_p11)
}
  0x58   :  { %49 = dma.hbm_to_vmem [thread:$0]  %s1722_s2, 64, %s47_s13, [#allocation6]  }
  0x59   :  { %s1375_s26 = scalar_lea.hbm %s1724_s4, 1024 }
  0x5a   :  { %p1376_p12 = scmp.ne.s32.totalorder %s1724_s4, %s1375_s26  ;;  %p1379_p13 = scmp.lt.u32.totalorder %s1375_s26, %s1724_s4 }
  0x5c   :  { %p1381_p0 = pnand %p1379_p13, %p1376_p12 }
  0x5e   :  { %1384 = shalt.err (!%p1381_p0)
}
  0x5f   :  { %s1385_s5 = scalar_lea.vmem %s1602_s15, 1024  ;;  %p1390_p2 = scmp.lt.s32.totalorder %s1602_s15, %s1602_s15 }
  0x60   :  { %p1386_p1 = scmp.ne.s32.totalorder %s1602_s15, %s1385_s5  ;;  %p1391_p3 = scmp.lt.s32.totalorder %s1385_s5, %s1385_s5 }
  0x62   :  { %p1392_p4 = por %p1391_p3, %p1390_p2 }
  0x64   :  { %p1393_p5 = pnand %p1392_p4, %p1386_p1 }
  0x66   :  { %1396 = shalt.err (!%p1393_p5)
}
  0x67   :  { %73 = dma.hbm_to_vmem [thread:$0]  %s1724_s4, 1024, %s1602_s15, [#allocation9], %s1481_s30, %s1481_s30, %s1482_s20  }
  0x68   :  { %s1485_s10 = smov [#allocation13]   ;;  %s1397_s16 = scalar_lea.hbm %s1726_s6, 384 }
  0x69   :  { %s92_s11 = sshll.u32 %s1485_s10, 4  ;;  %p1398_p6 = scmp.ne.s32.totalorder %s1726_s6, %s1397_s16  ;;  %s93_s11 = int_to_ptr.vmem [resolvable:$true] %s92_s11 }
  0x6a   :  { %p1401_p7 = scmp.lt.u32.totalorder %s1397_s16, %s1726_s6 }
  0x6c   :  { %p1403_p8 = pnand %p1401_p7, %p1398_p6 }
  0x6e   :  { %1406 = shalt.err (!%p1403_p8)
}
  0x6f   :  { %s1407_s21 = scalar_lea.vmem %s93_s11, 384  ;;  %p1412_p10 = scmp.lt.s32.totalorder %s93_s11, %s93_s11 }
  0x70   :  { %p1408_p9 = scmp.ne.s32.totalorder %s93_s11, %s1407_s21  ;;  %p1413_p11 = scmp.lt.s32.totalorder %s1407_s21, %s1407_s21 }
  0x72   :  { %p1414_p12 = por %p1413_p11, %p1412_p10 }
  0x74   :  { %p1415_p13 = pnand %p1414_p12, %p1408_p9 }
  0x76   :  { %1418 = shalt.err (!%p1415_p13)
}
  0x77   :  { %95 = dma.hbm_to_vmem [thread:$0]  %s1726_s6, 384, %s93_s11, [#allocation12]  }
  0x78   :  { %1463 = dma.done.wait [#allocation3], 16  }
  0x79   :  { %1464 = vsyncadd [#allocation3], 4294967280 }
  0x7a   :  { %1465 = dma.done.wait [#allocation6], 96  }
  0x7b   :  { %1466 = vsyncadd [#allocation6], 4294967200 }
  0x7c   :  { %1467 = dma.done.wait [#allocation9], 7168  }
  0x7d   :  { %1468 = vsyncadd [#allocation9], 4294960128 }
  0x7e   :  { %1469 = dma.done.wait [#allocation12], 1408  }
  0x7f   :  { %1470 = vsyncadd [#allocation12], 4294965888  ;;  %v1486_v0 = vmov 0.0   ;;  %vm1487_vm0 = vmmov 0   ;;  %vm132_vm1 = vcmask 1043456   ;;  %vm128_vm2 = vcmask 64512  }
  0x80   :  { %1065 = vmatprep.subr.bf16.mxu0 %v1486_v0  ;;  %1067 = vmatprep.mubr.msk.bf16.mxu0 %vm1487_vm0, %v1486_v0  ;;  %v127_v1 = vld [vmem:[#allocation7] sm:$0xf]  ;;  %v125_v2 = vld [vmem:[#allocation2] sm:$0x1]  ;;  %v1175_v4 = vld [vmem:[#allocation8 + $0x4] ss:$12 sps:$4 sm:$0xff]  }
  0x81   :  { %v134_v3 = vsel %vm132_vm1, %v127_v1, 0  ;;  %v1177_v5 = vld [vmem:[#allocation8] ss:$12 sps:$4 sm:$0xff]   ;;  %v1178_v6 = vld [vmem:[#allocation8 + $0x8] ss:$12 sps:$4 sm:$0xff]   ;;  %354 = vmatprep.subr.bf16.mxu1 %v1175_v4  ;;  %v1488_v29 = vmov 0  }
  0x82   :  { %1066 = vmatpush3.bf16.msra.mxu0 %v134_v3  ;;  %v1179_v7 = vld [vmem:[#allocation8 + $0x1c] ss:$12 sps:$4 sm:$0xff]   ;;  %355 = vmatpush1.bf16.msra.mxu1 %v1177_v5  ;;  %v1181_v8 = vld [vmem:[#allocation8 + $0x18] ss:$12 sps:$4 sm:$0xff]   ;;  %v1182_v9 = vld [vmem:[#allocation8 + $0x20] ss:$12 sps:$4 sm:$0xff]  }
  0x83   :  { %1071 = vmatprep.subr.bf16.mxu0 %v1486_v0  ;;  %356 = vmatprep.subr.bf16.mxu1 %v1179_v7  ;;  %v1183_v10 = vld [vmem:[#allocation8 + $0x34] ss:$12 sps:$4 sm:$0xff]   ;;  %v1185_v11 = vld [vmem:[#allocation8 + $0x30] ss:$12 sps:$4 sm:$0xff]   ;;  %v1187_v12 = vld [vmem:[#allocation8 + $0x4c] ss:$12 sps:$4 sm:$0xff]  }
  0x84   :  { %v1186_v13 = vld [vmem:[#allocation8 + $0x38] ss:$12 sps:$4 sm:$0xff]   ;;  %v1189_v14 = vld [vmem:[#allocation8 + $0x48] ss:$12 sps:$4 sm:$0xff]   ;;  %v1190_v16 = vld [vmem:[#allocation8 + $0x50] ss:$12 sps:$4 sm:$0xff]   ;;  %386 = vmatprep.mubr.bf16.mxu1 %v1488_v29 }
  0x85   :  { %1068 = vmatmul.mubr.msk.bf16.vlgmr.msra.gmra.mrb[0].mxu0 %vm128_vm2, %v125_v2  ;;  %v1191_v15 = vld [vmem:[#allocation8 + $0x64] ss:$12 sps:$4 sm:$0xff]   ;;  %v1193_v17 = vld [vmem:[#allocation8 + $0x60] ss:$12 sps:$4 sm:$0xff]   ;;  %v1194_v18 = vld [vmem:[#allocation8 + $0x68] ss:$12 sps:$4 sm:$0xff]  }
  0x86   :  { %1072 = vmatpush3.bf16.msra.mxu0 %v1178_v6  ;;  %1087 = vmatprep.mubr.msk.bf16.mxu0 %vm1487_vm0, %v1486_v0  ;;  %v1195_v19 = vld [vmem:[#allocation8 + $0x7c] ss:$12 sps:$4 sm:$0xff]   ;;  %v1197_v20 = vld [vmem:[#allocation8 + $0x78] ss:$12 sps:$4 sm:$0xff]   ;;  %v1199_v21 = vld [vmem:[#allocation8 + $0x94] ss:$12 sps:$4 sm:$0xff]  }
  0x87   :  { %1073 = vmatprep.subr.bf16.mxu0 %v1486_v0  ;;  %357 = vmatpush1.bf16.msra.mxu1 %v1181_v8  ;;  %v1198_v22 = vld [vmem:[#allocation8 + $0x80] ss:$12 sps:$4 sm:$0xff]   ;;  %v1201_v23 = vld [vmem:[#allocation8 + $0x90] ss:$12 sps:$4 sm:$0xff]   ;;  %v1202_v24 = vld [vmem:[#allocation8 + $0x98] ss:$12 sps:$4 sm:$0xff]  }
  0x88   :  { %358 = vmatprep.subr.bf16.mxu1 %v1183_v10  ;;  %v1203_v25 = vld [vmem:[#allocation8 + $0xac] ss:$12 sps:$4 sm:$0xff]   ;;  %v1205_v26 = vld [vmem:[#allocation8 + $0xa8] ss:$12 sps:$4 sm:$0xff]   ;;  %v1206_v27 = vld [vmem:[#allocation8 + $0xb0] ss:$12 sps:$4 sm:$0xff]  }
  0x89   :  { %v1209_v28 = vld [vmem:[#allocation8 + $0xc4] ss:$12 sps:$4 sm:$0xff]   ;;  %v118_v30 = vld [vmem:[#allocation13] ss:$0 sm:$0xff]  ;;  %v1228_v38 = vld [vmem:[#allocation8 + $0xc8] ss:$12 sps:$4 sm:$0xff]  }
  0x8a   :  { %1074 = vmatpush3.bf16.msra.mxu0 %v1182_v9  ;;  %v1207_v37 = vld [vmem:[#allocation8 + $0xc0] ss:$12 sps:$4 sm:$0xff]   ;;  %v1212_v40 = vld [vmem:[#allocation8 + $0xdc] ss:$12 sps:$4 sm:$0xff]   ;;  %v1210_v41 = vld [vmem:[#allocation8 + $0xd8] ss:$12 sps:$4 sm:$0xff]  }
  0x8b   :  { %1075 = vmatprep.subr.bf16.mxu0 %v1486_v0  ;;  %359 = vmatpush1.bf16.msra.mxu1 %v1185_v11  ;;  %v1232_v42 = vld [vmem:[#allocation8 + $0xe0] ss:$12 sps:$4 sm:$0xff]   ;;  %v1213_v44 = vld [vmem:[#allocation8 + $0xf0] ss:$12 sps:$4 sm:$0xff]   ;;  %v1233_v45 = vld [vmem:[#allocation8 + $0xf8] ss:$12 sps:$4 sm:$0xff]  }
  0x8c   :  { %360 = vmatprep.subr.bf16.mxu1 %v1187_v12  ;;  %v1215_v43 = vld [vmem:[#allocation8 + $0xf4] ss:$12 sps:$4 sm:$0xff]   ;;  %v1218_v46 = vld [vmem:[#allocation8 + $0x10c] ss:$12 sps:$4 sm:$0xff]   ;;  %v1234_v48 = vld [vmem:[#allocation8 + $0x110] ss:$12 sps:$4 sm:$0xff]  }
  0x8d   :  { %v1216_v47 = vld [vmem:[#allocation8 + $0x108] ss:$12 sps:$4 sm:$0xff]   ;;  %v1221_v49 = vld [vmem:[#allocation8 + $0x124] ss:$12 sps:$4 sm:$0xff]   ;;  %v1219_v50 = vld [vmem:[#allocation8 + $0x120] ss:$12 sps:$4 sm:$0xff]  }
  0x8e   :  { %1076 = vmatpush3.bf16.msra.mxu0 %v1186_v13  ;;  %v1235_v51 = vld [vmem:[#allocation8 + $0x128] ss:$12 sps:$4 sm:$0xff]   ;;  %v1222_v53 = vld [vmem:[#allocation8 + $0x138] ss:$12 sps:$4 sm:$0xff]   ;;  %v1236_v54 = vld [vmem:[#allocation8 + $0x140] ss:$12 sps:$4 sm:$0xff]  }
  0x8f   :  { %1077 = vmatprep.subr.bf16.mxu0 %v1486_v0  ;;  %361 = vmatpush1.bf16.msra.mxu1 %v1189_v14  ;;  %v1224_v52 = vld [vmem:[#allocation8 + $0x13c] ss:$12 sps:$4 sm:$0xff]   ;;  %v1227_v55 = vld [vmem:[#allocation8 + $0x154] ss:$12 sps:$4 sm:$0xff]   ;;  %v1237_v57 = vld [vmem:[#allocation8 + $0x158] ss:$12 sps:$4 sm:$0xff]  }
  0x90   :  { %362 = vmatprep.subr.bf16.mxu1 %v1191_v15  ;;  %v1225_v56 = vld [vmem:[#allocation8 + $0x150] ss:$12 sps:$4 sm:$0xff]   ;;  %v1231_v58 = vld [vmem:[#allocation8 + $0x16c] ss:$12 sps:$4 sm:$0xff]   ;;  %v1229_v59 = vld [vmem:[#allocation8 + $0x168] ss:$12 sps:$4 sm:$0xff]  }
  0x91   :  { %v1670_v60 = vld [vmem:[#allocation5] sm:$0x3]  ;;  %v1238_v61 = vld [vmem:[#allocation8 + $0x170] ss:$12 sps:$4 sm:$0xff]   ;;  %v1239_v63 = vld [vmem:[#allocation10] sm:$0xff]   ;;  %s1489_s6 = smov [#allocation15]  }
  0x92   :  { %1078 = vmatpush3.bf16.msra.mxu0 %v1190_v16  ;;  %v435_v62 = vpack.c.bf16 %v1670_v60, %v1670_v60  ;;  %v1240_v1 = vld [vmem:[#allocation10 + $0x8] sm:$0xff]   ;;  %v1241_v2 = vld [vmem:[#allocation10 + $0x10] sm:$0xff]   ;;  %v1242_v3 = vld [vmem:[#allocation10 + $0x18] sm:$0xff]   ;;  %s944_s20 = sshll.u32 %s1489_s6, 4  ;;  %s945_s20 = int_to_ptr.vmem [resolvable:$true] %s944_s20 }
  0x93   :  { %1079 = vmatprep.subr.bf16.mxu0 %v1486_v0  ;;  %363 = vmatpush1.bf16.msra.mxu1 %v1193_v17  ;;  %v1243_v4 = vld [vmem:[#allocation10 + $0x20] sm:$0xff]   ;;  %v1244_v5 = vld [vmem:[#allocation10 + $0x28] sm:$0xff]   ;;  %v1245_v6 = vld [vmem:[#allocation10 + $0x30] sm:$0xff]   ;;  %s1419_s15 = scalar_lea.vmem %s945_s20, 32  ;;  %p1424_p1 = scmp.lt.s32.totalorder %s945_s20, %s945_s20 }
  0x94   :  { %364 = vmatprep.subr.bf16.mxu1 %v1195_v19  ;;  %v1246_v7 = vld [vmem:[#allocation10 + $0x38] sm:$0xff]   ;;  %v1247_v8 = vld [vmem:[#allocation11] sm:$0xff]   ;;  %v1248_v9 = vld [vmem:[#allocation11 + $0x8] sm:$0xff]   ;;  %p1420_p0 = scmp.ne.s32.totalorder %s945_s20, %s1419_s15  ;;  %p1425_p2 = scmp.lt.s32.totalorder %s1419_s15, %s1419_s15 }
  0x95   :  { %v1249_v10 = vld [vmem:[#allocation11 + $0x10] sm:$0xff]   ;;  %v1250_v11 = vld [vmem:[#allocation11 + $0x18] sm:$0xff]   ;;  %v1251_v12 = vld [vmem:[#allocation11 + $0x20] sm:$0xff]  }
  0x96   :  { %1080 = vmatpush3.bf16.msra.mxu0 %v1194_v18  ;;  %v1252_v13 = vld [vmem:[#allocation11 + $0x28] sm:$0xff]   ;;  %v211_v18 = vlaneseq  ;;  %p1426_p3 = por %p1425_p2, %p1424_p1 }
  0x97   :  { %1081 = vmatprep.subr.bf16.mxu0 %v1486_v0  ;;  %365 = vmatpush1.bf16.msra.mxu1 %v1197_v20 }
  0x98   :  { %366 = vmatprep.subr.bf16.mxu1 %v1199_v21  ;;  %v212_v19 = vshrl.u32 %v211_v18, 7  ;;  %v122_v21 = vld [vmem:[#allocation13 + $0x2] ss:$8 sm:$0x7]  ;;  %p1427_p4 = pnand %p1426_p3, %p1420_p0 }
  0x9a   :  { %1082 = vmatpush3.bf16.msra.mxu0 %v1198_v22  ;;  %v213_v20 = vsub.s32 0, %v212_v19  ;;  %v120_v22 = vld [vmem:[#allocation13 + $0x1] ss:$8 sm:$0x7] }
  0x9b   :  { %1083 = vmatprep.subr.bf16.mxu0 %v1486_v0  ;;  %367 = vmatpush1.bf16.msra.mxu1 %v1201_v23  ;;  %v217_v23 = vsub.s32 1, %v212_v19 }
  0x9c   :  { %368 = vmatprep.subr.bf16.mxu1 %v1203_v25  ;;  %v473_v25 = vrot.slane %v122_v21, %v213_v20 }
  0x9e   :  { %1084 = vmatpush3.bf16.msra.mxu0 %v1202_v24  ;;  %v214_v24 = vrot.slane %v120_v22, %v213_v20 }
  0x9f   :  { %1085 = vmatprep.subr.bf16.mxu0 %v1486_v0  ;;  %369 = vmatpush1.bf16.msra.mxu1 %v1205_v26  ;;  %v218_v26 = vrot.slane %v120_v22, %v217_v23 }
  0xa0   :  { %613 = vmatprep.subr.bf16.mxu1 %v1209_v28  ;;  %v1151_v28 = vadd.f32 %v473_v25, %v214_v24 }
  0xa2   :  { %1086 = vmatpush3.bf16.msra.mxu0 %v1206_v27  ;;  %v477_v27 = vrot.slane %v122_v21, %v217_v23 }
  0xa3   :  { %1091 = vmatprep.subr.bf16.mxu0 %v1486_v0 }
 0x158   :  { %v170_v31 = vpop.f32.mrb[0].mxu0 }
 0x159   :  { %v171_v32 = vadd.f32 %v170_v31, %v118_v30  ;;  %v1069_v33 = vpop.f32.mrb[1].mxu0  ;;  %v1153_v30 = vadd.f32 %v477_v27, %v218_v26 }
 0x15a   :  { %v173_v34 = vpop.f32.mrb[2].mxu0 }
 0x15b   :  { %v176_v35 = vmax.f32 %v171_v32, 0.0  ;;  %v1070_v36 = vpop.f32.mrb[3].mxu0 }
 0x15d   :  { %v177_v39 = vpack.c.bf16 %v176_v35, %v176_v35 }
 0x15f   :  { %387 = vmatmul.mubr.bf16.vlgmr.msra.gmra.mrb[0].mxu1 %v177_v39  ;;  %1088 = vmatmul.mubr.bf16.vlgmr.msra.gmra.mrb[4].mxu0 %v177_v39 }
 0x160   :  { %614 = vmatpush1.bf16.msra.mxu1 %v1207_v37  ;;  %1092 = vmatpush3.bf16.msra.mxu0 %v1228_v38 }
 0x161   :  { %615 = vmatprep.subr.bf16.mxu1 %v1212_v40  ;;  %1093 = vmatprep.subr.bf16.mxu0 %v1486_v0 }
 0x162   :  { %645 = vmatprep.mubr.bf16.mxu1 %v1488_v29  ;;  %1107 = vmatprep.mubr.msk.bf16.mxu0 %vm1487_vm0, %v1486_v0 }
 0x164   :  { %616 = vmatpush1.bf16.msra.mxu1 %v1210_v41  ;;  %1094 = vmatpush3.bf16.msra.mxu0 %v1232_v42 }
 0x165   :  { %617 = vmatprep.subr.bf16.mxu1 %v1215_v43  ;;  %1095 = vmatprep.subr.bf16.mxu0 %v1486_v0 }
 0x168   :  { %618 = vmatpush1.bf16.msra.mxu1 %v1213_v44  ;;  %1096 = vmatpush3.bf16.msra.mxu0 %v1233_v45  ;;  %v221_v44 = vsub.s32 2, %v212_v19 }
 0x169   :  { %619 = vmatprep.subr.bf16.mxu1 %v1218_v46  ;;  %1097 = vmatprep.subr.bf16.mxu0 %v1486_v0 }
 0x16a   :  { %v481_v45 = vrot.slane %v122_v21, %v221_v44 }
 0x16c   :  { %620 = vmatpush1.bf16.msra.mxu1 %v1216_v47  ;;  %1098 = vmatpush3.bf16.msra.mxu0 %v1234_v48  ;;  %v222_v47 = vrot.slane %v120_v22, %v221_v44 }
 0x16d   :  { %621 = vmatprep.subr.bf16.mxu1 %v1221_v49  ;;  %1099 = vmatprep.subr.bf16.mxu0 %v1486_v0 }
 0x170   :  { %622 = vmatpush1.bf16.msra.mxu1 %v1219_v50  ;;  %1100 = vmatpush3.bf16.msra.mxu0 %v1235_v51 }
 0x171   :  { %623 = vmatprep.subr.bf16.mxu1 %v1224_v52  ;;  %1101 = vmatprep.subr.bf16.mxu0 %v1486_v0 }
 0x174   :  { %624 = vmatpush1.bf16.msra.mxu1 %v1222_v53  ;;  %1102 = vmatpush3.bf16.msra.mxu0 %v1236_v54 }
 0x175   :  { %625 = vmatprep.subr.bf16.mxu1 %v1227_v55  ;;  %1103 = vmatprep.subr.bf16.mxu0 %v1486_v0 }
 0x178   :  { %626 = vmatpush1.bf16.msra.mxu1 %v1225_v56  ;;  %1104 = vmatpush3.bf16.msra.mxu0 %v1237_v57 }
 0x179   :  { %627 = vmatprep.subr.bf16.mxu1 %v1231_v58  ;;  %1105 = vmatprep.subr.bf16.mxu0 %v1486_v0 }
 0x17c   :  { %628 = vmatpush1.bf16.msra.mxu1 %v1229_v59  ;;  %1106 = vmatpush3.bf16.msra.mxu0 %v1238_v61 }
 0x17d   :  { %1111 = vmatprep.subr.bf16.mxu1 %v1486_v0  ;;  %1131 = vmatprep.subr.bf16.mxu0 %v1486_v0 }
 0x17f   :  { %646 = vmatmul.mubr.bf16.vlgmr.msra.gmra.mrb[0].mxu1 %v435_v62  ;;  %1108 = vmatmul.mubr.bf16.vlgmr.msra.gmra.mrb[8].mxu0 %v435_v62  ;;  %v1253_v62 = vld [vmem:[#allocation11 + $0x30] sm:$0xff]  }
 0x180   :  { %1127 = vmatprep.mubr.msk.bf16.mxu1 %vm1487_vm0, %v1486_v0  ;;  %1147 = vmatprep.mubr.msk.bf16.mxu0 %vm1487_vm0, %v1486_v0 }
 0x181   :  { %1112 = vmatpush3.bf16.msra.mxu1 %v1239_v63  ;;  %1132 = vmatpush3.bf16.msra.mxu0 %v1247_v8  ;;  %v1254_v63 = vld [vmem:[#allocation11 + $0x38] sm:$0xff]  }
 0x182   :  { %1113 = vmatprep.subr.bf16.mxu1 %v1486_v0  ;;  %1133 = vmatprep.subr.bf16.mxu0 %v1486_v0 }
 0x185   :  { %1114 = vmatpush3.bf16.msra.mxu1 %v1240_v1  ;;  %1134 = vmatpush3.bf16.msra.mxu0 %v1248_v9  ;;  %v123_v1 = vld [vmem:[#allocation13 + $0x3] ss:$0 sm:$0xff] }
 0x186   :  { %1115 = vmatprep.subr.bf16.mxu1 %v1486_v0  ;;  %1135 = vmatprep.subr.bf16.mxu0 %v1486_v0 }
 0x189   :  { %1116 = vmatpush3.bf16.msra.mxu1 %v1241_v2  ;;  %1136 = vmatpush3.bf16.msra.mxu0 %v1249_v10 }
 0x18a   :  { %1117 = vmatprep.subr.bf16.mxu1 %v1486_v0  ;;  %1137 = vmatprep.subr.bf16.mxu0 %v1486_v0 }
 0x18d   :  { %1118 = vmatpush3.bf16.msra.mxu1 %v1242_v3  ;;  %1138 = vmatpush3.bf16.msra.mxu0 %v1250_v11 }
 0x18e   :  { %1119 = vmatprep.subr.bf16.mxu1 %v1486_v0  ;;  %1139 = vmatprep.subr.bf16.mxu0 %v1486_v0 }
 0x191   :  { %1120 = vmatpush3.bf16.msra.mxu1 %v1243_v4  ;;  %1140 = vmatpush3.bf16.msra.mxu0 %v1251_v12 }
 0x192   :  { %1121 = vmatprep.subr.bf16.mxu1 %v1486_v0  ;;  %1141 = vmatprep.subr.bf16.mxu0 %v1486_v0 }
 0x195   :  { %1122 = vmatpush3.bf16.msra.mxu1 %v1244_v5  ;;  %1142 = vmatpush3.bf16.msra.mxu0 %v1252_v13 }
 0x196   :  { %1123 = vmatprep.subr.bf16.mxu1 %v1486_v0  ;;  %1143 = vmatprep.subr.bf16.mxu0 %v1486_v0 }
 0x199   :  { %1124 = vmatpush3.bf16.msra.mxu1 %v1245_v6  ;;  %1144 = vmatpush3.bf16.msra.mxu0 %v1253_v62 }
 0x19a   :  { %1125 = vmatprep.subr.bf16.mxu1 %v1486_v0  ;;  %1145 = vmatprep.subr.bf16.mxu0 %v1486_v0 }
 0x19d   :  { %1126 = vmatpush3.bf16.msra.mxu1 %v1246_v7  ;;  %1146 = vmatpush3.bf16.msra.mxu0 %v1254_v63 }
 0x232   :  { %v429_v14 = vpop.f32.mrb[4].mxu0 }
 0x233   :  { %v1089_v15 = vpop.f32.mrb[5].mxu0  ;;  %v430_v51 = vadd.f32 %v429_v14, %v222_v47 }
 0x234   :  { %v432_v16 = vpop.f32.mrb[6].mxu0 }
 0x235   :  { %v1090_v17 = vpop.f32.mrb[7].mxu0 }
 0x252   :  { %v647_v29 = vpop.f32.mrb[0].mxu1  ;;  %v688_v31 = vpop.f32.mrb[8].mxu0 }
 0x253   :  { %v1152_v32 = vadd.f32 %v1151_v28, %v647_v29  ;;  %v649_v33 = vpop.f32.mrb[1].mxu1  ;;  %v1109_v34 = vpop.f32.mrb[9].mxu0  ;;  %v689_v49 = vadd.f32 %v688_v31, %v481_v45 }
 0x254   :  { %v651_v35 = vpop.f32.mrb[2].mxu1  ;;  %v691_v36 = vpop.f32.mrb[10].mxu0  ;;  %v1154_v40 = vadd.f32 %v1153_v30, %v649_v33 }
 0x255   :  { %v1009_v37 = vmul.f32 -1.442695, %v1152_v32  ;;  %v652_v38 = vpop.f32.mrb[3].mxu1  ;;  %v1110_v39 = vpop.f32.mrb[11].mxu0 }
 0x256   :  { %v1010_v41 = vmul.f32 -1.442695, %v1154_v40 }
 0x257   :  { %1255 = vpow2.f32 %v1009_v37 }
 0x258   :  { %1257 = vpow2.f32 %v1010_v41 }
 0x261   :  { %v1256_v42 = vpop.eup %1255 }
 0x262   :  { %v698_v43 = vadd.f32 1.0, %v1256_v42  ;;  %v1258_v46 = vpop.eup %1257 }
 0x263   :  { %v705_v48 = vadd.f32 1.0, %v1258_v46 }
 0x264   :  { %1259 = vrcp.f32 %v698_v43 }
 0x265   :  { %1261 = vrcp.f32 %v705_v48 }
 0x26e   :  { %v1260_v50 = vpop.eup %1259 }
 0x26f   :  { %v708_v52 = vmul.f32 %v1260_v50, %v689_v49  ;;  %v1262_v54 = vpop.eup %1261 }
 0x270   :  { %v711_v55 = vsub.f32 1.0, %v1262_v54  ;;  %v713_v58 = vmul.f32 %v1262_v54, %v1670_v60 }
 0x271   :  { %v709_v53 = vadd.f32 %v708_v52, %v430_v51 }
 0x273   :  { %1263 = vtanh.f32 %v709_v53 }
 0x27d   :  { %v1264_v56 = vpop.eup %1263 }
 0x27e   :  { %v712_v57 = vmul.f32 %v1264_v56, %v711_v55 }
 0x280   :  { %v714_v59 = vadd.f32 %v713_v58, %v712_v57 }
 0x282   :  { %v715_v61 = vpack.c.bf16 %v714_v59, %v714_v59  ;;  %927 = vst [vmem:[#allocation15] sm:$0x3] %v714_v59 }
 0x284   :  { %1128 = vmatmul.mubr.bf16.vlgmr.msra.gmra.mrb[4].mxu1 %v715_v61 }
 0x357   :  { %v814_v2 = vpop.f32.mrb[4].mxu1 }
 0x358   :  { %v815_v3 = vadd.f32 %v814_v2, %v123_v1  ;;  %v1129_v4 = vpop.f32.mrb[5].mxu1 }
 0x359   :  { %v817_v5 = vpop.f32.mrb[6].mxu1 }
 0x35a   :  { %v820_v6 = vmax.f32 %v815_v3, 0.0  ;;  %v1130_v7 = vpop.f32.mrb[7].mxu1 }
 0x35c   :  { %v821_v8 = vpack.c.bf16 %v820_v6, %v820_v6 }
 0x35e   :  { %1148 = vmatmul.mubr.bf16.vlgmr.msra.gmra.mrb[12].mxu0 %v821_v8 }
 0x35f   :  { %1430 = shalt.err (!%p1427_p4)
}
 0x360   :  { %s1431_s12 = scalar_lea.hbm %s1728_s8, 32 }
 0x361   :  { %p1432_p5 = scmp.ne.s32.totalorder %s1728_s8, %s1431_s12  ;;  %p1435_p6 = scmp.lt.u32.totalorder %s1431_s12, %s1728_s8 }
 0x363   :  { %p1437_p7 = pnand %p1435_p6, %p1432_p5 }
 0x365   :  { %1440 = shalt.err (!%p1437_p7)
}
 0x366   :  { %947 = dma.vmem_to_hbm [thread:$0]  %s945_s20, 32, %s1728_s8, [#allocation16]   ;;  %v124_v0 = vld [vmem:[#allocation13 + $0x4] ss:$0 sm:$0xff] }
 0x367   :  { %s1490_s28 = smov [#allocation14]  }
 0x368   :  { %s934_s29 = sshll.u32 %s1490_s28, 4  ;;  %s935_s29 = int_to_ptr.vmem [resolvable:$true] %s934_s29 }
 0x369   :  { %s1441_s5 = scalar_lea.vmem %s935_s29, 32  ;;  %p1446_p9 = scmp.lt.s32.totalorder %s935_s29, %s935_s29 }
 0x36a   :  { %p1442_p8 = scmp.ne.s32.totalorder %s935_s29, %s1441_s5  ;;  %p1447_p10 = scmp.lt.s32.totalorder %s1441_s5, %s1441_s5 }
 0x36c   :  { %p1448_p11 = por %p1447_p10, %p1446_p9 }
 0x36e   :  { %p1449_p12 = pnand %p1448_p11, %p1442_p8 }
 0x431   :  { %v920_v60 = vpop.f32.mrb[12].mxu0 }
 0x432   :  { %v921_v9 = vadd.f32 %v920_v60, %v124_v0  ;;  %v1149_v10 = vpop.f32.mrb[13].mxu0 }
 0x433   :  { %v923_v11 = vpop.f32.mrb[14].mxu0 }
 0x434   :  { %926 = vst [vmem:[#allocation14] sm:$0x3] %v921_v9  ;;  %v1150_v12 = vpop.f32.mrb[15].mxu0 }
 0x435   :  { %1452 = shalt.err (!%p1449_p12)
}
 0x436   :  { %s1453_s8 = scalar_lea.hbm %s1727_s7, 32 }
 0x437   :  { %p1454_p13 = scmp.ne.s32.totalorder %s1727_s7, %s1453_s8  ;;  %p1457_p0 = scmp.lt.u32.totalorder %s1453_s8, %s1727_s7 }
 0x439   :  { %p1459_p1 = pnand %p1457_p0, %p1454_p13 }
 0x43b   :  { %1462 = shalt.err (!%p1459_p1)
}
 0x43c   :  { %937 = dma.vmem_to_hbm [thread:$0]  %s935_s29, 32, %s1727_s7, [#allocation4]  }
 0x43d   :  { %1471 = dma.done.wait [#allocation4], 32  }
 0x43e   :  { %1472 = vsyncadd [#allocation4], 4294967264 }
 0x43f   :  { %1473 = dma.done.wait [#allocation16], 32  }
 0x440   :  { %1474 = vsyncadd [#allocation16], 4294967264 }
 0x441   :  { %954 = vsyncpa [#allocation3], 1 }
 0x442   :  { %955 = vsyncpa [#allocation6], 1 }
 0x443   :  { %956 = vsyncpa [#allocation9], 1 }
 0x444   :  { %957 = vsyncpa [#allocation12], 1 }
 0x445   :  { %958 = vsyncpa [#allocation4], 1 }
 0x446   :  { %959 = vsyncpa [#allocation16], 1 }

</bundles_post_ra>
